<compile_context>
chip_gen: v7x
topology: tpu7x:2x2x1
jax: 0.10.0
libtpu: 0.0.40
codegen_flags: <defaults>
</compile_context>

<pallas_src>
import functools

import jax
import jax.numpy as jnp
from jax.experimental import pallas as pl
from jax.experimental.pallas import tpu as pltpu

_BN_EPS = 1e-9  # matches torch.nn.BatchNorm1d(out_dim, eps=1e-09)


def perceptron_kernel(x_ref, w_ref, pgb_ref, o_ref, acc_ref):
    k = pl.program_id(1)

    @pl.when(k == 0)
    def _init():
        acc_ref[...] = jnp.zeros_like(acc_ref)

    # Linear partial product for this K tile (MXU, f32 accumulation).
    acc_ref[...] += jnp.dot(x_ref[...], w_ref[...], preferred_element_type=jnp.float32)

    @pl.when(k == pl.num_programs(1) - 1)
    def _finish():
        pgb = pgb_ref[...]                   # (3, TN): [bias; gamma; beta]
        bias = pgb[0:1, :]
        gamma = pgb[1:2, :]
        beta = pgb[2:3, :]

        # Bias + ReLU (dropout(p=0) is the identity).
        y = jnp.maximum(acc_ref[...] + bias, 0.0)

        # BatchNorm1d, training-mode (biased) batch statistics, two-pass variance.
        inv_n = 1.0 / y.shape[0]
        mean = jnp.sum(y, axis=0, keepdims=True) * inv_n
        centered = y - mean
        var = jnp.sum(centered * centered, axis=0, keepdims=True) * inv_n
        scale = gamma * jax.lax.rsqrt(var + _BN_EPS)

        # Single wide (lane-dense) store per tile.
        o_ref[...] = (centered * scale + beta).astype(o_ref.dtype)


def _round_up(x, m):
    return ((x + m - 1) // m) * m


def _choose_tiles(in_dim, out_dim):
    # Column tile: largest-fit <= 512, pad out_dim to a multiple of TN (never drop to 128
    # just because out_dim isn't a nice divisor).
    tn = min(512, _round_up(out_dim, 128))
    out_pad = _round_up(out_dim, tn)
    # v7x megacore: prefer >= 2 column tiles if we can get them without going below 128.
    while (out_pad // tn) < 2 and tn > 128:
        tn //= 2
        out_pad = _round_up(out_dim, tn)
    # K tile: single step for small in_dim, otherwise 512-wide (lane-aligned) K tiles.
    if in_dim <= 1024:
        tk, k_pad = in_dim, in_dim
    else:
        tk = 512
        k_pad = _round_up(in_dim, tk)
    return tn, out_pad, tk, k_pad


def _vmem_capacity_bytes():
    try:
        info = pltpu.get_tpu_info()
        for name in ("vmem_capacity_bytes", "vmem_bytes"):
            cap = getattr(info, name, None)
            if cap:
                return int(cap)
    except Exception:
        pass
    return 64 << 20  # v7x-safe default


def prepare_params(weight, bias, gamma, beta):
    """One-time (outside the hot path) padding / packing of parameters."""
    in_dim, out_dim = weight.shape
    _, out_pad, _, k_pad = _choose_tiles(in_dim, out_dim)
    w = weight
    if (k_pad, out_pad) != (in_dim, out_dim):
        w = jnp.pad(w, ((0, k_pad - in_dim), (0, out_pad - out_dim)))
    pad = out_pad - out_dim
    pgb = jnp.stack(
        [
            jnp.pad(bias.reshape(-1).astype(jnp.float32), (0, pad)),
            jnp.pad(gamma.reshape(-1).astype(jnp.float32), (0, pad), constant_values=1.0),
            jnp.pad(beta.reshape(-1).astype(jnp.float32), (0, pad)),
        ],
        axis=0,
    )  # (3, out_pad)
    return w, pgb


@functools.partial(jax.jit, static_argnames=("out_dim", "use_bf16_matmul"))
def perceptron_forward(x, w_pad, pgb_pad, *, out_dim, use_bf16_matmul=False):
    n, in_dim = x.shape
    k_pad_w, out_pad_w = w_pad.shape
    tn, out_pad, tk, k_pad = _choose_tiles(in_dim, out_dim)
    assert (k_pad, out_pad) == (k_pad_w, out_pad_w), "params not prepared for this shape"

    if k_pad != in_dim:
        x = jnp.pad(x, ((0, 0), (0, k_pad - in_dim)))

    if use_bf16_matmul:
        # Optional: halves W-stream bytes and hits v6e/v7x bf16 MXU peak; BN stays f32.
        x = x.astype(jnp.bfloat16)
        w_pad = w_pad.astype(jnp.bfloat16)

    grid = (out_pad // tn, k_pad // tk)

    # VMEM budget: double-buffered x/W/pgb/out tiles + f32 accumulator scratch.
    vmem_needed = (
        2 * n * tk * x.dtype.itemsize          # x tiles
        + 2 * tk * tn * w_pad.dtype.itemsize   # W tiles
        + 2 * 8 * tn * 4                       # pgb tiles (3 rows pad to 8 sublanes)
        + 2 * n * tn * 4                       # output tiles
        + n * tn * 4                           # accumulator scratch
    )
    cap = _vmem_capacity_bytes()
    vmem_limit = int(min(max(int(1.5 * vmem_needed), 16 << 20), int(0.8 * cap)))

    out_padded = pl.pallas_call(
        perceptron_kernel,
        out_shape=jax.ShapeDtypeStruct((n, out_pad), jnp.float32),
        grid=grid,
        in_specs=[
            pl.BlockSpec((n, tk), lambda j, k: (0, k)),   # x: K-streamed
            pl.BlockSpec((tk, tn), lambda j, k: (k, j)),  # W: K x N column tile
            pl.BlockSpec((3, tn), lambda j, k: (0, j)),   # packed bias/gamma/beta
        ],
        out_specs=pl.BlockSpec((n, tn), lambda j, k: (0, j)),
        scratch_shapes=[pltpu.VMEM((n, tn), jnp.float32)],
        compiler_params=pltpu.CompilerParams(
            dimension_semantics=("parallel", "arbitrary"),  # columns parallel, K reduction
            vmem_limit_bytes=vmem_limit,
        ),
    )(x, w_pad, pgb_pad)

    return out_padded[:, :out_dim]


def init_params(key, in_dim, out_dim):
    # Xavier-uniform weight, zero bias; BatchNorm affine: gamma=1, beta=0 (torch defaults).
    bound = (6.0 / (in_dim + out_dim)) ** 0.5
    weight = jax.random.uniform(
        key, (in_dim, out_dim), dtype=jnp.float32, minval=-bound, maxval=bound
    )
    bias = jnp.zeros((out_dim,), jnp.float32)
    gamma = jnp.ones((out_dim,), jnp.float32)
    beta = jnp.zeros((out_dim,), jnp.float32)
    return weight, bias, gamma, beta


if __name__ == "__main__":
    key = jax.random.PRNGKey(0)
    k_x, k_w = jax.random.split(key)

    batch, in_dim, out_dim = 8, 16, 32
    x = jax.random.normal(k_x, (batch, in_dim), dtype=jnp.float32)
    weight, bias, gamma, beta = init_params(k_w, in_dim, out_dim)

    # One-time parameter packing/padding (kept out of the per-call hot path).
    w_pad, pgb_pad = prepare_params(weight, bias, gamma, beta)

    out = perceptron_forward(x, w_pad, pgb_pad, out_dim=out_dim)
    jax.block_until_ready(out)

    # Pure-JAX reference of the same forward semantics.
    y_ref = jnp.maximum(x @ weight + bias[None, :], 0.0)
    mean = y_ref.mean(axis=0, keepdims=True)
    var = ((y_ref - mean) ** 2).mean(axis=0, keepdims=True)
    y_ref = (y_ref - mean) * jax.lax.rsqrt(var + _BN_EPS) * gamma[None, :] + beta[None, :]

    assert out.shape == (batch, out_dim)
    assert jnp.allclose(out, y_ref, atol=1e-4, rtol=1e-4)
    print("KERNEL_OK")
</pallas_src>

<mosaic_0001>
module attributes {stable_mosaic.version = 11 : i64} {
  func.func @perceptron_kernel(%arg0: i32, %arg1: i32, %arg2: memref<8x16xf32, #tpu.memory_space<vmem>>, %arg3: memref<16x128xf32, #tpu.memory_space<vmem>>, %arg4: memref<3x128xf32, #tpu.memory_space<vmem>>, %arg5: memref<8x128xf32, #tpu.memory_space<vmem>>, %arg6: memref<8x128xf32, #tpu.memory_space<vmem>>) attributes {dimension_semantics = [#tpu.dimension_semantics<parallel>, #tpu.dimension_semantics<arbitrary>], iteration_bounds = array<i64: 1, 1>, scalar_prefetch = 0 : i64, scratch_operands = 1 : i64, tpu.core_type = #tpu.core_type<tc>, window_params = [{transform_indices = @transform_0, window_bounds = array<i64: 8, 16>}, {transform_indices = @transform_1, window_bounds = array<i64: 16, 128>}, {transform_indices = @transform_2, window_bounds = array<i64: 3, 128>}, {transform_indices = @transform_3, window_bounds = array<i64: 8, 128>}]} {
    %c0_i32 = arith.constant 0 : i32
    %0 = arith.cmpi eq, %arg1, %c0_i32 : i32
    %1 = arith.extui %0 : i1 to i32
    %c0_i32_0 = arith.constant 0 : i32
    %2 = arith.cmpi ne, %1, %c0_i32_0 : i32
    scf.if %2 {
      %cst_10 = arith.constant 0.000000e+00 : f32
      %12 = vector.broadcast %cst_10 : f32 to vector<8x128xf32>
      %c0_11 = arith.constant 0 : index
      %c0_12 = arith.constant 0 : index
      %13 = vector.load %arg6[%c0_11, %c0_12] : memref<8x128xf32, #tpu.memory_space<vmem>>, vector<8x128xf32>
      tpu.vector_store %arg6[%c0_11, %c0_12], %12 {strides = array<i32>} : memref<8x128xf32, #tpu.memory_space<vmem>>, vector<8x128xf32>,
    } else {
    }
    %c0 = arith.constant 0 : index
    %c0_1 = arith.constant 0 : index
    %3 = vector.load %arg6[%c0, %c0_1] : memref<8x128xf32, #tpu.memory_space<vmem>>, vector<8x128xf32>
    %c0_2 = arith.constant 0 : index
    %c0_3 = arith.constant 0 : index
    %4 = vector.load %arg2[%c0_2, %c0_3] : memref<8x16xf32, #tpu.memory_space<vmem>>, vector<8x16xf32>
    %c0_4 = arith.constant 0 : index
    %c0_5 = arith.constant 0 : index
    %5 = vector.load %arg3[%c0_4, %c0_5] : memref<16x128xf32, #tpu.memory_space<vmem>>, vector<16x128xf32>
    %cst = arith.constant dense<0.000000e+00> : vector<8x128xf32>
    %6 = tpu.matmul %4, %5, %cst {dimension_numbers = #tpu.dot_dimension_numbers<[1], [0], [0], [1], [0, 0, 1, 1], [], []>} : vector<8x16xf32>, vector<16x128xf32>, vector<8x128xf32> -> vector<8x128xf32>
    %7 = arith.addf %3, %6 : vector<8x128xf32>
    %c0_6 = arith.constant 0 : index
    %c0_7 = arith.constant 0 : index
    %8 = vector.load %arg6[%c0_6, %c0_7] : memref<8x128xf32, #tpu.memory_space<vmem>>, vector<8x128xf32>
    tpu.vector_store %arg6[%c0_6, %c0_7], %7 {strides = array<i32>} : memref<8x128xf32, #tpu.memory_space<vmem>>, vector<8x128xf32>,
    %c0_i32_8 = arith.constant 0 : i32
    %9 = arith.cmpi eq, %arg1, %c0_i32_8 : i32
    %10 = arith.extui %9 : i1 to i32
    %c0_i32_9 = arith.constant 0 : i32
    %11 = arith.cmpi ne, %10, %c0_i32_9 : i32
    scf.if %11 {
      %c0_10 = arith.constant 0 : index
      %c0_11 = arith.constant 0 : index
      %12 = vector.load %arg4[%c0_10, %c0_11] : memref<3x128xf32, #tpu.memory_space<vmem>>, vector<3x128xf32>
      %13 = vector.extract_strided_slice %12 {offsets = [0, 0], sizes = [1, 128], strides = [1, 1]} : vector<3x128xf32> to vector<1x128xf32>
      %14 = vector.extract_strided_slice %12 {offsets = [1, 0], sizes = [1, 128], strides = [1, 1]} : vector<3x128xf32> to vector<1x128xf32>
      %15 = vector.extract_strided_slice %12 {offsets = [2, 0], sizes = [1, 128], strides = [1, 1]} : vector<3x128xf32> to vector<1x128xf32>
      %c0_12 = arith.constant 0 : index
      %c0_13 = arith.constant 0 : index
      %16 = vector.load %arg6[%c0_12, %c0_13] : memref<8x128xf32, #tpu.memory_space<vmem>>, vector<8x128xf32>
      %17 = vector.broadcast %13 : vector<1x128xf32> to vector<8x128xf32>
      %18 = arith.addf %16, %17 : vector<8x128xf32>
      %cst_14 = arith.constant 0.000000e+00 : f32
      %19 = vector.broadcast %cst_14 : f32 to vector<8x128xf32>
      %20 = arith.maximumf %18, %19 : vector<8x128xf32>
      %cst_15 = arith.constant dense<0.000000e+00> : vector<128xf32>
      %21 = vector.multi_reduction <add>, %20, %cst_15 [0] : vector<8x128xf32> to vector<128xf32>
      %22 = vector.shape_cast %21 : vector<128xf32> to vector<1x128xf32>
      %cst_16 = arith.constant 1.250000e-01 : f32
      %23 = vector.broadcast %cst_16 : f32 to vector<1x128xf32>
      %24 = arith.mulf %22, %23 : vector<1x128xf32>
      %25 = vector.broadcast %24 : vector<1x128xf32> to vector<8x128xf32>
      %26 = arith.subf %20, %25 : vector<8x128xf32>
      %27 = arith.mulf %26, %26 : vector<8x128xf32>
      %cst_17 = arith.constant dense<0.000000e+00> : vector<128xf32>
      %28 = vector.multi_reduction <add>, %27, %cst_17 [0] : vector<8x128xf32> to vector<128xf32>
      %29 = vector.shape_cast %28 : vector<128xf32> to vector<1x128xf32>
      %cst_18 = arith.constant 1.250000e-01 : f32
      %30 = vector.broadcast %cst_18 : f32 to vector<1x128xf32>
      %31 = arith.mulf %29, %30 : vector<1x128xf32>
      %cst_19 = arith.constant 9.99999971E-10 : f32
      %32 = vector.broadcast %cst_19 : f32 to vector<1x128xf32>
      %33 = arith.addf %31, %32 : vector<1x128xf32>
      %34 = math.rsqrt %33 : vector<1x128xf32>
      %35 = arith.mulf %14, %34 : vector<1x128xf32>
      %36 = vector.broadcast %35 : vector<1x128xf32> to vector<8x128xf32>
      %37 = arith.mulf %26, %36 : vector<8x128xf32>
      %38 = vector.broadcast %15 : vector<1x128xf32> to vector<8x128xf32>
      %39 = arith.addf %37, %38 : vector<8x128xf32>
      %c0_20 = arith.constant 0 : index
      %c0_21 = arith.constant 0 : index
      %40 = vector.load %arg5[%c0_20, %c0_21] : memref<8x128xf32, #tpu.memory_space<vmem>>, vector<8x128xf32>
      tpu.vector_store %arg5[%c0_20, %c0_21], %39 {strides = array<i32>} : memref<8x128xf32, #tpu.memory_space<vmem>>, vector<8x128xf32>,
    } else {
    }
    return
  }
  func.func @transform_0(%arg0: i32, %arg1: i32) -> (i32, i32) {
    %c0_i32 = arith.constant 0 : i32
    %c0_i32_0 = arith.constant 0 : i32
    return %c0_i32, %arg1 : i32, i32
  }
  func.func @transform_1(%arg0: i32, %arg1: i32) -> (i32, i32) {
    %c0_i32 = arith.constant 0 : i32
    return %arg1, %arg0 : i32, i32
  }
  func.func @transform_2(%arg0: i32, %arg1: i32) -> (i32, i32) {
    %c0_i32 = arith.constant 0 : i32
    %c0_i32_0 = arith.constant 0 : i32
    return %c0_i32, %arg0 : i32, i32
  }
  func.func @transform_3(%arg0: i32, %arg1: i32) -> (i32, i32) {
    %c0_i32 = arith.constant 0 : i32
    %c0_i32_0 = arith.constant 0 : i32
    return %c0_i32, %arg0 : i32, i32
  }
}

</mosaic_0001>

<bundles_post_ra>
// kernel: perceptron_forward.1
= control target key start
LH: loop header
LB: loop body
LE: loop exit
PB: predicated region body
PF: predicated region fallthrough
CT: control target
= control target key end

     0   :  { %8 = vsyncpa [#allocation4], 0  ;;  %s353_s0 = inlined_call_operand.hbm [shape: f32[8,16], index: 0, kind: input, shape index: {}]   ;;  %s354_s1 = inlined_call_operand.hbm [shape: f32[16,128], index: 1, kind: input, shape index: {}]   ;;  %s355_s2 = inlined_call_operand.vmem [shape: f32[3,128], index: 2, kind: input, shape index: {}]   ;;  %s356_s3 = inlined_call_operand.hbm [shape: f32[8,128], index: 3, kind: output, shape index: {}]  }
   0x1   :  { %9 = vsyncpa [#allocation7], 0 }
   0x2   :  { %10 = vsyncpa [#allocation5], 0  ;;  %s279_s12 = smov [#allocation3]   ;;  %s280_s14 = smov [#allocation6]  }
   0x3   :  { %s17_s13 = sshll.u32 %s279_s12, 4  ;;  %s26_s15 = sshll.u32 %s280_s14, 4  ;;  %s18_s13 = int_to_ptr.vmem [resolvable:$true] %s17_s13  ;;  %s307_s15 = int_to_ptr.vmem [resolvable:$true] %s26_s15 }
   0x4   :  { %s207_s18 = scalar_lea.hbm %s353_s0, 128 }
   0x5   :  { %p208_p0 = scmp.ne.s32.totalorder %s353_s0, %s207_s18  ;;  %p211_p1 = scmp.lt.u32.totalorder %s207_s18, %s353_s0 }
   0x7   :  { %p213_p2 = pnand %p211_p1, %p208_p0 }
   0x9   :  { %216 = shalt.err (!%p213_p2)
}
   0xa   :  { %s217_s23 = scalar_lea.vmem %s18_s13, 128  ;;  %p222_p4 = scmp.lt.s32.totalorder %s18_s13, %s18_s13 }
   0xb   :  { %p218_p3 = scmp.ne.s32.totalorder %s18_s13, %s217_s23  ;;  %p223_p5 = scmp.lt.s32.totalorder %s217_s23, %s217_s23 }
   0xd   :  { %p224_p6 = por %p223_p5, %p222_p4 }
   0xf   :  { %p225_p7 = pnand %p224_p6, %p218_p3 }
  0x11   :  { %228 = shalt.err (!%p225_p7)
}
  0x12   :  { %20 = dma.hbm_to_vmem [thread:$0]  %s353_s0, 128, %s18_s13, [#allocation4]  }
  0x13   :  { %s229_s28 = scalar_lea.hbm %s354_s1, 256 }
  0x14   :  { %p230_p8 = scmp.ne.s32.totalorder %s354_s1, %s229_s28  ;;  %p233_p9 = scmp.lt.u32.totalorder %s229_s28, %s354_s1 }
  0x16   :  { %p235_p10 = pnand %p233_p9, %p230_p8 }
  0x18   :  { %238 = shalt.err (!%p235_p10)
}
  0x19   :  { %s239_s6 = scalar_lea.vmem %s307_s15, 256  ;;  %p244_p12 = scmp.lt.s32.totalorder %s307_s15, %s307_s15 }
  0x1a   :  { %p240_p11 = scmp.ne.s32.totalorder %s307_s15, %s239_s6  ;;  %p245_p13 = scmp.lt.s32.totalorder %s239_s6, %s239_s6 }
  0x1c   :  { %p246_p0 = por %p245_p13, %p244_p12 }
  0x1e   :  { %p247_p1 = pnand %p246_p0, %p240_p11 }
  0x20   :  { %250 = shalt.err (!%p247_p1)
}
  0x21   :  { %s281_s0 = smov 128   ;;  %s282_s7 = smov 8  }
  0x22   :  { %32 = dma.hbm_to_vmem [thread:$0]  %s354_s1, 256, %s307_s15, [#allocation7], %s281_s0, %s281_s0, %s282_s7  }
  0x23   :  { %273 = dma.done.wait [#allocation4], 128  }
  0x24   :  { %274 = vsyncadd [#allocation4], 4294967168 }
  0x25   :  { %275 = dma.done.wait [#allocation7], 256  }
  0x26   :  { %276 = vsyncadd [#allocation7], 4294967040  ;;  %v283_v0 = vmov 0.0|0.0   ;;  %vm284_vm0 = vmmov 0   ;;  %v285_v1 = vmov 0.0   ;;  %v48_v2 = vld [vmem:[#allocation6] sm:$0xff]  ;;  %v131_v6 = vlaneseq }
  0x27   :  { %194 = vmatprep.subr.bf16.mxu0 %v283_v0  ;;  %191 = vmatprep.mubr.msk.f32.mxu0 %vm284_vm0, %v285_v1  ;;  %v49_v3 = vld [vmem:[#allocation6 + $0x8] sm:$0xff]  ;;  %v47_v5 = vld [vmem:[#allocation3] sm:$0xff]  ;;  %vm50_vm1 = vcmask 130048  }
  0x28   :  { %v195_v4 = vpack.c.bf16 %v49_v3, %v48_v2  ;;  %v132_v7 = vshrl.u32 %v131_v6, 7  ;;  %v129_v9 = vld [vmem:[%s355_s2] sm:$0x7]  ;;  %s286_s2 = smov [#allocation8]  }
  0x29   :  { %s173_s11 = sshll.u32 %s286_s2, 4  ;;  %s174_s11 = int_to_ptr.vmem [resolvable:$true] %s173_s11 }
  0x2a   :  { %196 = vmatpush3.bf16.msra.mxu0 %v195_v4  ;;  %v133_v8 = vsub.s32 0, %v132_v7  ;;  %v158_v32 = vsub.s32 1, %v132_v7  ;;  %v163_v33 = vsub.s32 2, %v132_v7  ;;  %s251_s12 = scalar_lea.vmem %s174_s11, 128  ;;  %p256_p3 = scmp.lt.s32.totalorder %s174_s11, %s174_s11 }
  0x2b   :  { %p252_p2 = scmp.ne.s32.totalorder %s174_s11, %s251_s12  ;;  %p257_p4 = scmp.lt.s32.totalorder %s251_s12, %s251_s12 }
  0x2c   :  { %v134_v10 = vrot.slane %v129_v9, %v133_v8  ;;  %v164_v37 = vrot.slane %v129_v9, %v163_v33 }
  0x2d   :  { %192 = vmatmul.mubr.msk.f32.vlgmr.msra.gmra.mrb[0].mxu0 %vm50_vm1, %v47_v5  ;;  %p258_p5 = por %p257_p4, %p256_p3 }
  0x2f   :  { %p259_p6 = pnand %p258_p5, %p252_p2 }
 0x100   :  { %v120_v11 = vpop.f32.mrb[0].mxu0 }
 0x101   :  { %v135_v12 = vadd.f32 %v134_v10, %v120_v11  ;;  %v193_v13 = vpop.f32.mrb[1].mxu0 }
 0x103   :  { %v136_v14 = vmax.f32 %v135_v12, 0.0 }
 0x105   :  { %v137_v15 = vrot.slane %v136_v14, 4 }
 0x107   :  { %v138_v16 = vadd.f32 %v137_v15, %v136_v14 }
 0x109   :  { %v139_v17 = vrot.slane %v138_v16, 2 }
 0x10b   :  { %v140_v18 = vadd.f32 %v139_v17, %v138_v16 }
 0x10d   :  { %v141_v19 = vrot.slane %v140_v18, 1 }
 0x10f   :  { %v142_v20 = vadd.f32 %v141_v19, %v140_v18 }
 0x111   :  { %v143_v21 = vmul.f32 0.125, %v142_v20 }
 0x113   :  { %v144_v22 = vsub.f32 %v136_v14, %v143_v21 }
 0x115   :  { %v145_v23 = vmul.f32 %v144_v22, %v144_v22 }
 0x117   :  { %v146_v24 = vrot.slane %v145_v23, 4 }
 0x119   :  { %v147_v25 = vadd.f32 %v146_v24, %v145_v23 }
 0x11b   :  { %v148_v26 = vrot.slane %v147_v25, 2 }
 0x11d   :  { %v149_v27 = vadd.f32 %v148_v26, %v147_v25 }
 0x11f   :  { %v150_v28 = vrot.slane %v149_v27, 1 }
 0x121   :  { %v151_v29 = vadd.f32 %v150_v28, %v149_v27 }
 0x123   :  { %v152_v30 = vmul.f32 0.125, %v151_v29 }
 0x125   :  { %v153_v31 = vadd.f32 1e-09, %v152_v30 }
 0x127   :  { %205 = vrsqrt.f32 %v153_v31 }
 0x131   :  { %v206_v34 = vpop.eup %205 }
 0x132   :  { %v155_v35 = vmul.f32 %v206_v34, %v129_v9 }
 0x134   :  { %v159_v36 = vrot.slane %v155_v35, %v158_v32 }
 0x136   :  { %v160_v38 = vmul.f32 %v159_v36, %v144_v22 }
 0x138   :  { %v165_v39 = vadd.f32 %v164_v37, %v160_v38 }
 0x13a   :  { %166 = vst [vmem:[#allocation8] sm:$0xff] %v165_v39 }
 0x13b   :  { %262 = shalt.err (!%p259_p6)
}
 0x13c   :  { %s263_s15 = scalar_lea.hbm %s356_s3, 128 }
 0x13d   :  { %p264_p7 = scmp.ne.s32.totalorder %s356_s3, %s263_s15  ;;  %p267_p8 = scmp.lt.u32.totalorder %s263_s15, %s356_s3 }
 0x13f   :  { %p269_p9 = pnand %p267_p8, %p264_p7 }
 0x141   :  { %272 = shalt.err (!%p269_p9)
}
 0x142   :  { %176 = dma.vmem_to_hbm [thread:$0]  %s174_s11, 128, %s356_s3, [#allocation5]  }
 0x143   :  { %277 = dma.done.wait [#allocation5], 128  }
 0x144   :  { %278 = vsyncadd [#allocation5], 4294967168 }
 0x145   :  { %180 = vsyncpa [#allocation4], 1 }
 0x146   :  { %181 = vsyncpa [#allocation7], 1 }
 0x147   :  { %182 = vsyncpa [#allocation5], 1 }

</bundles_post_ra>
